<compile_context>
chip_gen: v7x
topology: tpu7x:2x2x1
jax: 0.10.0
libtpu: 0.0.40
codegen_flags: <defaults>
</compile_context>

<pallas_src>
import functools

import jax
import jax.numpy as jnp
from jax.experimental import pallas as pl
from jax.experimental.pallas import tpu as pltpu

# ----------------------------- configuration --------------------------------
INPUT_DIM = 4            # number of possible channels (one Linear embedder each)
EMBED_DIM = 128          # lane-dense (multiple of 128); reference default 768
PATCH_SIZE = 4
IMAGE_SIZE = 16
BATCH = 2
CHANNELS = (1, 2, 4)     # 1-indexed channel ids present in the input
NUM_PATCHES = (IMAGE_SIZE // PATCH_SIZE) ** 2      # 16
PATCH_PIXELS = PATCH_SIZE * PATCH_SIZE             # 16


# ----------------------------- encoding helpers -----------------------------
def get_positional_encodings(embed_dim, num_patches, channel_wise=False):
    """Standard 1-D sine/cosine positional encoding over the patch index."""
    del channel_wise  # TODO(synk): exact torchgeo channel_wise split not in the spec
    pos = jnp.arange(num_patches, dtype=jnp.float32)[:, None]
    dim = jnp.arange(0, embed_dim, 2, dtype=jnp.float32)[None, :]
    angle = pos / jnp.power(10000.0, dim / float(embed_dim))
    pe = jnp.zeros((num_patches, embed_dim), jnp.float32)
    pe = pe.at[:, 0::2].set(jnp.sin(angle))
    pe = pe.at[:, 1::2].set(jnp.cos(angle))
    return pe                                              # (L, D)


def get_channel_encodings(embed_dim, channels):
    """Sinusoidal encoding over the (1-indexed) channel id, one row per channel."""
    ch = jnp.asarray(channels, dtype=jnp.float32)[:, None]
    dim = jnp.arange(0, embed_dim, 2, dtype=jnp.float32)[None, :]
    angle = ch / jnp.power(10000.0, dim / float(embed_dim))
    ce = jnp.zeros((len(channels), embed_dim), jnp.float32)
    ce = ce.at[:, 0::2].set(jnp.sin(angle))
    ce = ce.at[:, 1::2].set(jnp.cos(angle))
    return ce                                              # (C, D)


# ----------------------------- patch extraction ------------------------------
def _patchify(x, patch_size):
    """F.unfold(x, P, stride=P) applied per channel -> (B, C, L, P*P)."""
    B, C, H, W = x.shape
    P = patch_size
    Hp, Wp = H // P, W // P
    p = x.reshape(B, C, Hp, P, Wp, P)
    p = p.transpose(0, 1, 2, 4, 3, 5)                      # (B, C, Hp, Wp, P, P)
    return p.reshape(B, C, Hp * Wp, P * P)


# --------------------------------- kernel ------------------------------------
def _embed_kernel(p_ref, w_ref, row_ref, pe_ref, o_ref, *, batch, num_channels):
    # Single MXU matmul: (B*L, C*PP) @ block-diag (C*PP, C*D) -> (B*L, C*D).
    y = jnp.dot(p_ref[...], w_ref[...],
                preferred_element_type=jnp.float32)        # (B*L, C*D) f32
    # On-chip broadcast of the encodings (VPU):
    #   pos enc (L, D) tiled over batch (sublanes) and channels (lanes),
    #   fused bias(+channel enc) row (1, C*D) broadcast over rows.
    addend = jnp.tile(pe_ref[...], (batch, num_channels)) + row_ref[...]
    o_ref[...] = (y + addend).astype(o_ref.dtype)


# --------------------------------- wrapper ------------------------------------
def encoder_embedding(x, w_all, b_all, *, channels, patch_size,
                      channel_wise=False):
    """x: (B, len(channels), H, W) f32.

    Returns (B*C, L, D) if not channel_wise, else (B, C*L, D) — matching the
    PyTorch module's output layout.
    """
    B, C, H, W = x.shape
    assert C == len(channels)
    L = (H // patch_size) * (W // patch_size)
    D = w_all.shape[-1]
    PP = patch_size * patch_size

    # Layout plumbing (zero FLOPs): interleave channels into the lane dim so the
    # kernel sees one lane-dense (B*L, C*PP) slab.
    patches = _patchify(x, patch_size)                     # (B, C, L, PP)
    patches2d = patches.transpose(0, 2, 1, 3).reshape(B * L, C * PP)

    idx = jnp.asarray([c - 1 for c in channels], jnp.int32)
    w_sel = w_all[idx]                                     # (C, PP, D)
    # Block-diagonal weight: column block c only sees pixel block c.
    w_bd = jnp.zeros((C * PP, C * D), w_all.dtype)
    for i in range(C):                                     # static tiny loop
        w_bd = w_bd.at[i * PP:(i + 1) * PP, i * D:(i + 1) * D].set(w_sel[i])

    # Fused per-channel row term: bias (+ channel encoding if channel_wise).
    row = b_all[idx]                                       # (C, D)
    if channel_wise:
        row = row + get_channel_encodings(D, channels)
    row = row.reshape(1, C * D)

    pe = get_positional_encodings(D, L, channel_wise)      # (L, D) only

    kernel = functools.partial(_embed_kernel, batch=B, num_channels=C)

    out2d = pl.pallas_call(                                # single invocation, no grid
        kernel,
        out_shape=jax.ShapeDtypeStruct((B * L, C * D), x.dtype),
        in_specs=[
            pl.BlockSpec(memory_space=pltpu.MemorySpace.VMEM),  # patches (B*L, C*PP)
            pl.BlockSpec(memory_space=pltpu.MemorySpace.VMEM),  # block-diag weight
            pl.BlockSpec(memory_space=pltpu.MemorySpace.VMEM),  # bias(+chan) row (1, C*D)
            pl.BlockSpec(memory_space=pltpu.MemorySpace.VMEM),  # pos enc (L, D)
        ],
        out_specs=pl.BlockSpec(memory_space=pltpu.MemorySpace.VMEM),
    )(patches2d, w_bd, row, pe)                            # (B*L, C*D)

    # Un-interleave to the module's output layout (cheap wrapper transpose).
    out = out2d.reshape(B, L, C, D).transpose(0, 2, 1, 3)  # (B, C, L, D)
    if channel_wise:
        return out.reshape(B, C * L, D)
    return out.reshape(B * C, L, D)


# ----------------------------- pure-JAX reference -----------------------------
def _ref_forward(x, w_all, b_all, channels, patch_size, channel_wise=False):
    B, C, H, W = x.shape
    L = (H // patch_size) * (W // patch_size)
    D = w_all.shape[-1]
    patches = _patchify(x, patch_size)
    xs = [patches[:, i] @ w_all[ch - 1] + b_all[ch - 1]
          for i, ch in enumerate(channels)]                # each (B, L, D)
    y = jnp.stack(xs, axis=1).reshape(B * C, L, D)         # stack(dim=1).flatten(0,1)
    y = y + get_positional_encodings(D, L, channel_wise)
    if channel_wise:
        y = y.reshape(B, C * L, D)
        y = y + jnp.repeat(get_channel_encodings(D, channels), L, axis=0)
    return y


# ----------------------------------- main --------------------------------------
if __name__ == "__main__":
    key = jax.random.PRNGKey(0)
    kx, kw, kb = jax.random.split(key, 3)
    x = jax.random.normal(
        kx, (BATCH, len(CHANNELS), IMAGE_SIZE, IMAGE_SIZE), jnp.float32)
    # nn.Linear weights stored transposed as (in_features, out_features).
    w_all = 0.02 * jax.random.normal(
        kw, (INPUT_DIM, PATCH_PIXELS, EMBED_DIM), jnp.float32)
    b_all = 0.01 * jax.random.normal(kb, (INPUT_DIM, EMBED_DIM), jnp.float32)

    embed = jax.jit(encoder_embedding,
                    static_argnames=("channels", "patch_size", "channel_wise"))

    for channel_wise in (False, True):
        out = embed(x, w_all, b_all, channels=CHANNELS,
                    patch_size=PATCH_SIZE, channel_wise=channel_wise)
        out = jax.block_until_ready(out)
        ref = _ref_forward(x, w_all, b_all, CHANNELS, PATCH_SIZE, channel_wise)
        expect = ((BATCH, len(CHANNELS) * NUM_PATCHES, EMBED_DIM)
                  if channel_wise else
                  (BATCH * len(CHANNELS), NUM_PATCHES, EMBED_DIM))
        assert out.shape == expect, (out.shape, expect)
        assert jnp.allclose(out, ref, atol=1e-5, rtol=1e-5), (
            float(jnp.max(jnp.abs(out - ref))))

    print("KERNEL_OK")
</pallas_src>

<mosaic_0001>
module attributes {stable_mosaic.version = 11 : i64} {
  func.func @_embed_kernel(%arg0: memref<32x48xf32, #tpu.memory_space<vmem>>, %arg1: memref<48x384xf32, #tpu.memory_space<vmem>>, %arg2: memref<1x384xf32, #tpu.memory_space<vmem>>, %arg3: memref<16x128xf32, #tpu.memory_space<vmem>>, %arg4: memref<32x384xf32, #tpu.memory_space<vmem>>) attributes {dimension_semantics = [], scalar_prefetch = 0 : i64, scratch_operands = 0 : i64, tpu.core_type = #tpu.core_type<tc>} {
    %c0 = arith.constant 0 : index
    %c0_0 = arith.constant 0 : index
    %0 = vector.load %arg0[%c0, %c0_0] : memref<32x48xf32, #tpu.memory_space<vmem>>, vector<32x48xf32>
    %c0_1 = arith.constant 0 : index
    %c0_2 = arith.constant 0 : index
    %1 = vector.load %arg1[%c0_1, %c0_2] : memref<48x384xf32, #tpu.memory_space<vmem>>, vector<48x384xf32>
    %cst = arith.constant dense<0.000000e+00> : vector<32x384xf32>
    %2 = tpu.matmul %0, %1, %cst {dimension_numbers = #tpu.dot_dimension_numbers<[1], [0], [0], [1], [0, 0, 1, 1], [], []>} : vector<32x48xf32>, vector<48x384xf32>, vector<32x384xf32> -> vector<32x384xf32>
    %c0_3 = arith.constant 0 : index
    %c0_4 = arith.constant 0 : index
    %3 = vector.load %arg3[%c0_3, %c0_4] : memref<16x128xf32, #tpu.memory_space<vmem>>, vector<16x128xf32>
    %4 = tpu.concatenate %3, %3 in 0 : vector<16x128xf32>, vector<16x128xf32> -> vector<32x128xf32>
    %5 = tpu.concatenate %4, %4, %4 in 1 : vector<32x128xf32>, vector<32x128xf32>, vector<32x128xf32> -> vector<32x384xf32>
    %c0_5 = arith.constant 0 : index
    %c0_6 = arith.constant 0 : index
    %6 = vector.load %arg2[%c0_5, %c0_6] : memref<1x384xf32, #tpu.memory_space<vmem>>, vector<1x384xf32>
    %7 = vector.broadcast %6 : vector<1x384xf32> to vector<32x384xf32>
    %8 = arith.addf %5, %7 : vector<32x384xf32>
    %9 = arith.addf %2, %8 : vector<32x384xf32>
    %c0_7 = arith.constant 0 : index
    %c0_8 = arith.constant 0 : index
    %10 = vector.load %arg4[%c0_7, %c0_8] : memref<32x384xf32, #tpu.memory_space<vmem>>, vector<32x384xf32>
    tpu.vector_store %arg4[%c0_7, %c0_8], %9 {strides = array<i32>} : memref<32x384xf32, #tpu.memory_space<vmem>>, vector<32x384xf32>,
    return
  }
}

</mosaic_0001>

<bundles_post_ra>
// kernel: encoder_embedding.1
= control target key start
LH: loop header
LB: loop body
LE: loop exit
PB: predicated region body
PF: predicated region fallthrough
CT: control target
= control target key end

     0   :  { %v328_v3 = vmov 0.0   ;;  %vm64_vm0 = vcmask 392192   ;;  %v43_v32 = vlaneseq  ;;  %s473_s1 = inlined_call_operand.vmem [shape: f32[48,384], index: 1, kind: input, shape index: {}]   ;;  %s474_s0 = inlined_call_operand.vmem [shape: f32[32,48], index: 0, kind: input, shape index: {}]   ;;  %s475_s2 = inlined_call_operand.vmem [shape: f32[1,384], index: 2, kind: input, shape index: {}]   ;;  %s476_s3 = inlined_call_operand.vmem [shape: f32[16,128], index: 3, kind: input, shape index: {}]   ;;  %s477_s4 = inlined_call_operand.vmem [shape: f32[32,384], index: 4, kind: output, shape index: {}]  }
   0x1   :  { %v22_v0 = vld [vmem:[%s473_s1 + $0x8] sm:$0xff]  ;;  %v25_v1 = vld [vmem:[%s473_s1 + $0x20] sm:$0xff]  ;;  %141 = vmatprep.mubr.f32.mxu0 %v328_v3  ;;  %v24_v5 = vld [vmem:[%s473_s1 + $0x18] sm:$0xff] }
   0x2   :  { %v21_v2 = vld [vmem:[%s473_s1] sm:$0xff]  ;;  %v303_v4 = vpack.c.bf16 %v25_v1, %v22_v0  ;;  %v28_v6 = vld [vmem:[%s473_s1 + $0x38] sm:$0xff]  ;;  %v31_v7 = vld [vmem:[%s473_s1 + $0x50] sm:$0xff]  ;;  %v44_v33 = vshrl.u32 %v43_v32, 7 }
   0x3   :  { %v305_v8 = vpack.c.bf16 %v24_v5, %v21_v2  ;;  %v307_v9 = vpack.c.bf16 %v31_v7, %v28_v6  ;;  %v27_v10 = vld [vmem:[%s473_s1 + $0x30] sm:$0xff]  ;;  %v30_v11 = vld [vmem:[%s473_s1 + $0x48] sm:$0xff]  ;;  %v37_v15 = vld [vmem:[%s473_s1 + $0x80] sm:$0xff] }
   0x4   :  { %v23_v12 = vld [vmem:[%s473_s1 + $0x10] sm:$0xff]  ;;  %304 = vmatprep.subr.bf16.mxu0 %v303_v4  ;;  %v26_v13 = vld [vmem:[%s473_s1 + $0x28] sm:$0xff]  ;;  %v309_v16 = vpack.c.bf16 %v30_v11, %v27_v10  ;;  %v33_v18 = vld [vmem:[%s473_s1 + $0x60] sm:$0xff]  ;;  %v45_v34 = vsub.s32 0, %v44_v33  ;;  %v49_v36 = vsub.s32 1, %v44_v33  ;;  %v53_v37 = vsub.s32 2, %v44_v33 }
   0x5   :  { %v34_v14 = vld [vmem:[%s473_s1 + $0x68] sm:$0xff]  ;;  %306 = vmatpush1.bf16.msra.mxu0 %v305_v8  ;;  %v315_v17 = vpack.c.bf16 %v26_v13, %v23_v12  ;;  %v36_v19 = vld [vmem:[%s473_s1 + $0x78] sm:$0xff]  ;;  %v29_v20 = vld [vmem:[%s473_s1 + $0x40] sm:$0xff] }
   0x6   :  { %308 = vmatprep.subr.bf16.mxu0 %v307_v9  ;;  %v311_v21 = vpack.c.bf16 %v37_v15, %v34_v14  ;;  %v32_v22 = vld [vmem:[%s473_s1 + $0x58] sm:$0xff]  ;;  %v17_v23 = vld [vmem:[%s474_s0] sm:$0xff]  ;;  %v35_v24 = vld [vmem:[%s473_s1 + $0x70] sm:$0xff]  ;;  %v313_v27 = vpack.c.bf16 %v36_v19, %v33_v18 }
   0x7   :  { %316 = vmatprep.subr.bf16.mxu1 %v315_v17  ;;  %v319_v25 = vpack.c.bf16 %v32_v22, %v29_v20  ;;  %v38_v26 = vld [vmem:[%s473_s1 + $0x88] sm:$0xff]  ;;  %297 = vmatprep.mubr.msk.f32.mxu1 %vm64_vm0, %v17_v23  ;;  %v19_v30 = vld [vmem:[%s474_s0 + $0x10] sm:$0xff]  ;;  %v20_v31 = vld [vmem:[%s474_s0 + $0x18] sm:$0xff] }
   0x8   :  { %318 = vmatpush3.bf16.msra.mxu1 %v315_v17  ;;  %v323_v28 = vpack.c.bf16 %v38_v26, %v35_v24  ;;  %v18_v29 = vld [vmem:[%s474_s0 + $0x8] sm:$0xff]  ;;  %v41_v35 = vld [vmem:[%s475_s2] sm:$0x7] }
   0x9   :  { %310 = vmatpush1.bf16.msra.mxu0 %v309_v16  ;;  %320 = vmatprep.subr.bf16.mxu1 %v319_v25  ;;  %v46_v38 = vrot.slane %v41_v35, %v45_v34  ;;  %v39_v39 = vld [vmem:[%s476_s3] sm:$0xff]  ;;  %v50_v40 = vrot.slane %v41_v35, %v49_v36  ;;  %v54_v41 = vrot.slane %v41_v35, %v53_v37  ;;  %v40_v44 = vld [vmem:[%s476_s3 + $0x8] sm:$0xff] }
   0xa   :  { %312 = vmatprep.subr.bf16.mxu0 %v311_v21 }
   0xb   :  { %v58_v42 = vadd.f32 %v46_v38, %v39_v39  ;;  %v59_v43 = vadd.f32 %v50_v40, %v39_v39  ;;  %v63_v46 = vadd.f32 %v54_v41, %v40_v44  ;;  %v61_v49 = vadd.f32 %v46_v38, %v40_v44 }
   0xc   :  { %322 = vmatpush3.bf16.msra.mxu1 %v319_v25  ;;  %v60_v50 = vadd.f32 %v54_v41, %v39_v39  ;;  %v62_v52 = vadd.f32 %v50_v40, %v40_v44 }
   0xd   :  { %314 = vmatpush1.bf16.msra.mxu0 %v313_v27  ;;  %324 = vmatprep.subr.bf16.mxu1 %v323_v28 }
  0x10   :  { %267 = vmatmul.mubr.msk.f32.vlgmr.msra.gmra.mrb[0].mxu0 %vm64_vm0, %v17_v23  ;;  %326 = vmatpush3.bf16.msra.mxu1 %v323_v28 }
  0x11   :  { %147 = vmatprep.mubr.f32.mxu0 %v328_v3 }
  0x13   :  { %298 = vmatmul.mubr.msk.f32.vlgmr.msra.gmra.mrb[0].mxu1 %vm64_vm0, %v18_v29 }
  0x14   :  { %268 = vmatmul.mubr.msk.f32.gmra.mrb[2].mxu0 %vm64_vm0, %v18_v29  ;;  %300 = vmatprep.mubr.msk.f32.mxu1 %vm64_vm0, %v19_v30 }
  0x15   :  { %153 = vmatprep.mubr.f32.mxu0 %v328_v3 }
  0x17   :  { %301 = vmatmul.mubr.msk.f32.gmra.mrb[2].mxu1 %vm64_vm0, %v20_v31 }
  0x18   :  { %269 = vmatmul.mubr.msk.f32.gmra.mrb[4].mxu0 %vm64_vm0, %v19_v30 }
  0x19   :  { %159 = vmatprep.mubr.f32.mxu0 %v328_v3 }
  0x1c   :  { %270 = vmatmul.mubr.msk.f32.gmra.mrb[6].mxu0 %vm64_vm0, %v20_v31 }
  0xe3   :  { %v143_v45 = vpop.f32.mrb[0].mxu0 }
  0xe4   :  { %v144_v47 = vadd.f32 %v143_v45, %v58_v42  ;;  %v145_v48 = vpop.f32.mrb[1].mxu0 }
  0xe5   :  { %v146_v51 = vadd.f32 %v145_v48, %v59_v43 }
  0xe6   :  { %251 = vst [vmem:[%s477_s4] sm:$0xff] %v144_v47  ;;  %v299_v53 = vpop.f32.mrb[0].mxu1 }
  0xe7   :  { %252 = vst [vmem:[%s477_s4 + $0x8] sm:$0xff] %v146_v51  ;;  %v149_v54 = vpop.f32.mrb[2].mxu0  ;;  %v238_v55 = vadd.f32 %v299_v53, %v63_v46  ;;  %v232_v56 = vpop.f32.mrb[1].mxu1 }
  0xe8   :  { %v150_v57 = vadd.f32 %v149_v54, %v61_v49  ;;  %v151_v58 = vpop.f32.mrb[3].mxu0  ;;  %v233_v59 = vadd.f32 %v232_v56, %v60_v50 }
  0xe9   :  { %v152_v60 = vadd.f32 %v151_v58, %v62_v52  ;;  %256 = vst [vmem:[%s477_s4 + $0x28] sm:$0xff] %v238_v55 }
  0xea   :  { %254 = vst [vmem:[%s477_s4 + $0x18] sm:$0xff] %v150_v57  ;;  %253 = vst [vmem:[%s477_s4 + $0x10] sm:$0xff] %v233_v59  ;;  %v302_v61 = vpop.f32.mrb[2].mxu1 }
  0xeb   :  { %255 = vst [vmem:[%s477_s4 + $0x20] sm:$0xff] %v152_v60  ;;  %v155_v62 = vpop.f32.mrb[4].mxu0  ;;  %v248_v63 = vadd.f32 %v302_v61, %v63_v46  ;;  %v242_v0 = vpop.f32.mrb[3].mxu1 }
  0xec   :  { %v156_v1 = vadd.f32 %v155_v62, %v58_v42  ;;  %v157_v2 = vpop.f32.mrb[5].mxu0  ;;  %v243_v3 = vadd.f32 %v242_v0, %v60_v50 }
  0xed   :  { %v158_v4 = vadd.f32 %v157_v2, %v59_v43  ;;  %262 = vst [vmem:[%s477_s4 + $0x58] sm:$0xff] %v248_v63 }
  0xee   :  { %257 = vst [vmem:[%s477_s4 + $0x30] sm:$0xff] %v156_v1  ;;  %259 = vst [vmem:[%s477_s4 + $0x40] sm:$0xff] %v243_v3 }
  0xef   :  { %258 = vst [vmem:[%s477_s4 + $0x38] sm:$0xff] %v158_v4  ;;  %v161_v5 = vpop.f32.mrb[6].mxu0 }
  0xf0   :  { %v162_v6 = vadd.f32 %v161_v5, %v61_v49  ;;  %v163_v7 = vpop.f32.mrb[7].mxu0 }
  0xf1   :  { %v164_v8 = vadd.f32 %v163_v7, %v62_v52 }
  0xf2   :  { %260 = vst [vmem:[%s477_s4 + $0x48] sm:$0xff] %v162_v6 }
  0xf3   :  { %261 = vst [vmem:[%s477_s4 + $0x50] sm:$0xff] %v164_v8 }

</bundles_post_ra>
